<compile_context>
chip_gen: v7x
topology: tpu7x:2x2x1
jax: 0.10.0
libtpu: 0.0.40
codegen_flags: <defaults>
</compile_context>

<pallas_src>
import jax
import jax.numpy as jnp
from jax.experimental import pallas as pl
from jax.experimental.pallas import tpu as pltpu


def _freq_tvt2_kernel(wt_ref, x_ref, o_ref):
    # wt_ref : (P, L)   folded operator W^T (f32); constant index map -> stays
    #                   VMEM-resident (no re-DMA) across grid steps.
    # x_ref  : (L, TN)  lane-dense slab of flattened (batch * channel) columns.
    # o_ref  : (P, TN)  matching output slab (dense, unmasked stores).
    o_ref[...] = jnp.dot(
        wt_ref[...],
        x_ref[...].astype(wt_ref.dtype),
        preferred_element_type=jnp.float32,  # f32 accumulate, DEFAULT MXU precision
    ).astype(o_ref.dtype)


def precompute_freq_tvt2_operator(fno, seq_len, pred_len):
    """Fold rfft -> (. @ fno) -> irfft into one real (pred_len, seq_len) operator.

    Exact by linearity of the whole forward along the time axis.  Compute once
    per fno update and reuse across forward calls (hoisted off the hot path).
    Kept in float32 regardless of activation dtype: FFT-derived coefficients
    span a wide dynamic range.
    """
    L = int(seq_len)
    P = int(pred_len)
    eye = jnp.eye(L, dtype=jnp.float32)
    F = jnp.fft.rfft(eye, axis=-1)                                  # (L, L//2+1)
    A = jnp.einsum("lk,kp->lp", F, fno,
                   precision=jax.lax.Precision.HIGHEST)             # (L, P//2+1)
    W = jnp.fft.irfft(A, n=P, axis=-1)                              # (L, P) real
    return jnp.asarray(W.T, dtype=jnp.float32)                      # (P, L)


def _vmem_limit_bytes():
    # ~96 MiB on 128 MiB parts (v5e/v6e), ~48 MiB on 64 MiB v7x.
    try:
        cap = int(pltpu.get_tpu_info().vmem_capacity_bytes)
    except Exception:
        cap = 64 * 1024 * 1024
    return int(min(96 * 1024 * 1024, (cap * 3) // 4))


def freq_tvt2_forward(x, wt, *, n_block=512):
    """x: (B, seq_len, enc_in) real; wt: (pred_len, seq_len) f32 folded operator.

    Returns (B, pred_len, enc_in), matching Freq_TVT2.forward.
    """
    B, L, C = x.shape
    P, Lw = wt.shape
    assert Lw == L, (wt.shape, x.shape)

    N = B * C
    # Present a lane-dense slab: (L, B*C).  One XLA transpose each way is cheap
    # layout plumbing; it avoids masked sub-128-lane stores inside the kernel.
    x_flat = jnp.transpose(x, (1, 0, 2)).reshape(L, N)

    # Column-tile size: multiple of 128 (dense vst / contiguous DMA rows) with
    # at least 2 grid steps when N is big enough (feeds both TCs on v7x);
    # full N when tiny (block == full dim is always legal).
    if N <= 256:
        tn = N
    else:
        tn = min(int(n_block), 128 * pl.cdiv(pl.cdiv(N, 2), 128))
    grid = (pl.cdiv(N, tn),)

    out_flat = pl.pallas_call(
        _freq_tvt2_kernel,
        out_shape=jax.ShapeDtypeStruct((P, N), x.dtype),
        grid_spec=pltpu.PrefetchScalarGridSpec(
            num_scalar_prefetch=0,
            grid=grid,
            in_specs=[
                # Weight: constant block index -> DMA'd once, VMEM-resident.
                pl.BlockSpec((P, L), lambda j: (0, 0)),
                # Input slab: full length L, TN flattened (batch*channel) cols.
                pl.BlockSpec((L, tn), lambda j: (0, j)),
            ],
            out_specs=pl.BlockSpec((P, tn), lambda j: (0, j)),
        ),
        compiler_params=pltpu.CompilerParams(
            dimension_semantics=("parallel",),
            vmem_limit_bytes=_vmem_limit_bytes(),
        ),
    )(wt, x_flat)

    # (P, B*C) -> (B, P, C)
    return jnp.transpose(out_flat.reshape(P, B, C), (1, 0, 2))


if __name__ == "__main__":
    # Small shapes consistent with the module: configs.seq_len=16,
    # configs.pred_len=8, configs.enc_in=8, batch=2.
    batch, seq_len, pred_len, enc_in = 2, 16, 8, 8
    K1 = seq_len // 2 + 1
    K2 = pred_len // 2 + 1

    k_fno_r, k_fno_i, k_x = jax.random.split(jax.random.PRNGKey(0), 3)
    # nn.Parameter(0.02 * torch.randn(..., dtype=cfloat)) analogue.
    fno = 0.02 * (
        jax.random.normal(k_fno_r, (K1, K2), dtype=jnp.float32)
        + 1j * jax.random.normal(k_fno_i, (K1, K2), dtype=jnp.float32)
    )
    x = jax.random.normal(k_x, (batch, seq_len, enc_in), dtype=jnp.float32)

    # Fold the weights once (cached across forwards whenever fno is unchanged).
    wt = jax.block_until_ready(precompute_freq_tvt2_operator(fno, seq_len, pred_len))

    out = jax.jit(freq_tvt2_forward)(x, wt)
    out = jax.block_until_ready(out)

    # Pure-JAX reference of the PyTorch forward (transpose / rfft / einsum / irfft).
    xt = jnp.transpose(x, (0, 2, 1))                         # (B, C, L)
    x_fft = jnp.fft.rfft(xt, axis=-1)                        # (B, C, K1)
    out_fft = jnp.einsum("bcx,xl->bcl", x_fft, fno,
                         precision=jax.lax.Precision.HIGHEST)
    ref = jnp.fft.irfft(out_fft, n=pred_len, axis=-1)        # (B, C, P)
    ref = jnp.transpose(ref, (0, 2, 1))                      # (B, P, C)

    assert out.shape == (batch, pred_len, enc_in), out.shape
    max_err = float(jnp.max(jnp.abs(out - ref)))
    assert jnp.allclose(out, ref, atol=2e-3, rtol=2e-3), f"mismatch, max_err={max_err}"

    print("KERNEL_OK")
</pallas_src>

<mosaic_0001>
module attributes {stable_mosaic.version = 11 : i64} {
  func.func @_freq_tvt2_kernel(%arg0: i32, %arg1: memref<8x16xf32, #tpu.memory_space<vmem>>, %arg2: memref<16x16xf32, #tpu.memory_space<vmem>>, %arg3: memref<8x16xf32, #tpu.memory_space<vmem>>) attributes {dimension_semantics = [#tpu.dimension_semantics<parallel>], iteration_bounds = array<i64: 1>, scalar_prefetch = 0 : i64, scratch_operands = 0 : i64, tpu.core_type = #tpu.core_type<tc>, window_params = [{pipeline_mode = #tpu.pipeline_mode<synchronous>, transform_indices = @transform_0, window_bounds = array<i64: 8, 16>}, {transform_indices = @transform_1, window_bounds = array<i64: 16, 16>}, {transform_indices = @transform_2, window_bounds = array<i64: 8, 16>}]} {
    %c0 = arith.constant 0 : index
    %c0_0 = arith.constant 0 : index
    %0 = vector.load %arg1[%c0, %c0_0] : memref<8x16xf32, #tpu.memory_space<vmem>>, vector<8x16xf32>
    %c0_1 = arith.constant 0 : index
    %c0_2 = arith.constant 0 : index
    %1 = vector.load %arg2[%c0_1, %c0_2] : memref<16x16xf32, #tpu.memory_space<vmem>>, vector<16x16xf32>
    %cst = arith.constant dense<0.000000e+00> : vector<8x16xf32>
    %2 = tpu.matmul %0, %1, %cst {dimension_numbers = #tpu.dot_dimension_numbers<[1], [0], [0], [1], [0, 0, 1, 1], [], []>} : vector<8x16xf32>, vector<16x16xf32>, vector<8x16xf32> -> vector<8x16xf32>
    %c0_3 = arith.constant 0 : index
    %c0_4 = arith.constant 0 : index
    %3 = vector.load %arg3[%c0_3, %c0_4] : memref<8x16xf32, #tpu.memory_space<vmem>>, vector<8x16xf32>
    tpu.vector_store %arg3[%c0_3, %c0_4], %2 {strides = array<i32>} : memref<8x16xf32, #tpu.memory_space<vmem>>, vector<8x16xf32>,
    return
  }
  func.func @transform_0(%arg0: i32) -> (i32, i32) {
    %c0_i32 = arith.constant 0 : i32
    %c0_i32_0 = arith.constant 0 : i32
    %c0_i32_1 = arith.constant 0 : i32
    return %c0_i32, %c0_i32_0 : i32, i32
  }
  func.func @transform_1(%arg0: i32) -> (i32, i32) {
    %c0_i32 = arith.constant 0 : i32
    %c0_i32_0 = arith.constant 0 : i32
    return %c0_i32, %arg0 : i32, i32
  }
  func.func @transform_2(%arg0: i32) -> (i32, i32) {
    %c0_i32 = arith.constant 0 : i32
    %c0_i32_0 = arith.constant 0 : i32
    return %c0_i32, %arg0 : i32, i32
  }
}

</mosaic_0001>

<bundles_post_ra>
// kernel: freq_tvt2_forward.1
= control target key start
LH: loop header
LB: loop body
LE: loop exit
PB: predicated region body
PF: predicated region fallthrough
CT: control target
= control target key end

     0   :  { %v110_v0 = vmov 0.0|0.0   ;;  %vm111_vm0 = vmmov 0   ;;  %v112_v3 = vmov 0.0   ;;  %vm14_vm1 = vcmask 130048   ;;  %s140_s1 = inlined_call_operand.vmem [shape: f32[16,16], index: 1, kind: input, shape index: {}]   ;;  %s141_s0 = inlined_call_operand.vmem [shape: f32[8,16], index: 0, kind: input, shape index: {}]   ;;  %s142_s2 = inlined_call_operand.vmem [shape: f32[8,16], index: 2, kind: output, shape index: {}]  }
   0x1   :  { %104 = vmatprep.subr.bf16.mxu0 %v110_v0  ;;  %v12_v1 = vld [vmem:[%s140_s1] sm:$0xff]  ;;  %v13_v2 = vld [vmem:[%s140_s1 + $0x8] sm:$0xff]  ;;  %101 = vmatprep.mubr.msk.f32.mxu0 %vm111_vm0, %v112_v3 }
   0x2   :  { %v105_v4 = vpack.c.bf16 %v13_v2, %v12_v1  ;;  %v11_v5 = vld [vmem:[%s141_s0] sm:$0xff] }
   0x4   :  { %106 = vmatpush3.bf16.msra.mxu0 %v105_v4 }
   0x7   :  { %102 = vmatmul.mubr.msk.f32.vlgmr.msra.gmra.mrb[0].mxu0 %vm14_vm1, %v11_v5 }
  0xda   :  { %v84_v6 = vpop.f32.mrb[0].mxu0 }
  0xdb   :  { %88 = vst.msk [vmem:[%s142_s2] sm:$0xff] %vm14_vm1, %v84_v6  ;;  %v103_v7 = vpop.f32.mrb[1].mxu0 }

</bundles_post_ra>
